<compile_context>
chip_gen: v7x
topology: tpu7x:2x2x1
jax: 0.10.0
libtpu: 0.0.40
codegen_flags: <defaults>
</compile_context>

<pallas_src>
import functools

import jax
import jax.numpy as jnp
from jax.experimental import pallas as pl
from jax.experimental.pallas import tpu as pltpu

_BN_EPS = 1e-5


# --------------------------------------------------------------------------
# generation dispatch
# --------------------------------------------------------------------------
def _device_kind():
    try:
        return jax.devices()[0].device_kind.lower()
    except Exception:  # pragma: no cover - defensive only
        return ""


def _use_bf16_elementwise(kind):
    # v5 and earlier have no bf16 VALU: keep the elementwise chain in f32
    # there (bf16 would unpack and run slower).  v6e/v7x/newer: bf16 halves
    # the VALU instruction count on the 6x-expanded (hidden, px) intermediate,
    # which is the saturating VLIW slot on those generations.
    return not any(t in kind for t in ("v2", "v3", "v4", "v5"))


def _vmem_limit_bytes(kind):
    # v7x has only 64 MiB physical VMEM -> stay well under it.
    if ("v7" in kind) or ("tpu7" in kind) or ("7x" in kind):
        return 48 * 1024 * 1024
    return 64 * 1024 * 1024


# --------------------------------------------------------------------------
# kernel
# --------------------------------------------------------------------------
def _inverted_residual_kernel(*refs, nb, use_shortcut, has_expand, ew_dtype):
    """One grid step = `nb` images x one pixel tile, NCHW kept, pixels on lanes.

    NOTE: the last pixel tile may be partial (pl.cdiv grid); out-of-bounds
    lanes are read into the dots but nothing reduces over the lane axis and
    out-of-bounds stores are masked, so this is harmless.  Do NOT add a
    lane-wise reduction over the tile here.
    """
    if has_expand:
        x_ref, w1_ref, c1_ref, a2_ref, c2_ref, w3_ref, c3_ref, o_ref = refs
        w1 = w1_ref[...]            # (hp, c_in)  bf16, BN1 scale folded in
        c1 = c1_ref[...]            # (hp, 1)     elementwise dtype
    else:
        x_ref, a2_ref, c2_ref, w3_ref, c3_ref, o_ref = refs
        w1 = c1 = None

    a2 = a2_ref[...]                # (hp, 1) depthwise weight * BN2 scale
    c2 = c2_ref[...]                # (hp, 1) BN2 bias
    w3 = w3_ref[...]                # (c_out, hp) bf16, BN3 scale folded in
    c3 = c3_ref[...]                # (c_out, 1)  f32 BN3 bias

    # Static unroll over the nb images packed into this block (nb is small by
    # construction); keeps every matmul a plain 2-D MXU op with pixels on the
    # lane axis and avoids any in-kernel transpose.
    for b in range(nb):
        x = x_ref[b]                                  # (c_in, tile_px)
        if has_expand:
            # expand 1x1 conv (c_in -> hidden); BN1 scale pre-folded into w1
            # TODO(synk): optional MXU micro-opt - fold c1 into dot-1 by
            # appending a ones row to x and a c1 column to w1 (K=c_in is far
            # below the MXU width anyway); skipped to avoid an in-VMEM concat.
            y = jnp.dot(w1, x.astype(jnp.bfloat16),
                        preferred_element_type=jnp.float32)
            y = y.astype(ew_dtype) + c1               # BN1 bias
            y = jnp.minimum(jnp.maximum(y, 0), 6)     # ReLU6
        else:
            y = x.astype(ew_dtype)                    # hidden == c_in

        # "depthwise" 1x1 conv (groups=hidden -> per-channel scalar) + BN2
        y = y * a2 + c2
        y = jnp.minimum(jnp.maximum(y, 0), 6)         # ReLU6

        # project 1x1 conv (hidden -> c_out); BN3 scale pre-folded (linear)
        z = jnp.dot(w3, y.astype(jnp.bfloat16),
                    preferred_element_type=jnp.float32)
        z = z + c3
        if use_shortcut:
            z = z + x.astype(jnp.float32)             # exact (un-rounded) x
        o_ref[b] = z.astype(o_ref.dtype)


# --------------------------------------------------------------------------
# wrapper
# --------------------------------------------------------------------------
def _fold_bn(gamma, beta, mean, var):
    scale = gamma / jnp.sqrt(var + _BN_EPS)
    bias = beta - mean * scale
    return scale, bias


def _plan_blocks(n, px, c_in, hp, c_out, in_bytes, out_bytes, ew_bytes,
                 budget_bytes=20 * 1024 * 1024):
    """Pick (images-per-step nb, pixel tile) under a ~20 MiB per-step budget.

    Budget accounts for double-buffered input/output blocks, double-buffered
    bf16 weights + vectors, the elementwise (hp, tile) intermediate and the
    f32 dot accumulators.  20 MiB is safe on every generation including
    v7x's 64 MiB physical VMEM.  Lane tiles are a multiple of 128 or the
    full extent.
    """
    fixed = 2 * 2 * (hp * c_in + c_out * hp) + 4 * (4 * hp + 2 * c_out)
    per_px = (2 * in_bytes * c_in          # double-buffered x block
              + 2 * out_bytes * c_out      # double-buffered out block
              + ew_bytes * hp              # elementwise intermediate
              + 4 * hp                     # f32 dot-1 accumulator
              + 4 * c_out)                 # f32 projection accumulator
    max_work = max(128, (budget_bytes - fixed) // per_px)   # px*images / step

    if px >= 128:
        nb = 1
        if max_work >= px:
            tile = px
            # keep >=2 grid steps so both v7x TensorCores get work
            if n == 1 and px >= 256:
                tile = max(128, ((px // 2) // 128) * 128)
        else:
            tile = max(128, (max_work // 128) * 128)
        return nb, int(tile)

    # Small-spatial tail blocks (px = 7*7 / 14*14 in real MobileNetV2): pack
    # whole images per grid step so each step has >= ~512 lanes of work, the
    # weights are re-touched fewer times and DMAs are large and contiguous.
    tile = px
    want = min(n, max(1, -(-512 // px)), max(1, max_work // px))
    if n > 1:
        want = min(want, max(1, n // 2))   # keep >=2 steps for dual-TC v7x
    nb = 1
    for d in range(want, 0, -1):           # largest divisor of n <= want
        if n % d == 0:
            nb = d
            break
    return int(nb), int(tile)
    # TODO(synk): for px < 128 with c_out >= 128 (160/320-channel tail
    # blocks), flip to a channel-last store layout so stores are lane-dense
    # instead of masked vst.msk.


def inverted_residual(x, params, *, stride, expand_ratio, out_channel,
                      out_dtype=None):
    """x: NCHW. Returns NCHW. One fused Pallas call, no layout round trips.

    Pass out_dtype=jnp.bfloat16 when the consumer allows to halve write
    traffic (recommended inside a full bf16 network).
    """
    n, c_in, h, w = x.shape
    out_dtype = x.dtype if out_dtype is None else out_dtype
    use_shortcut = (stride == 1) and (c_in == out_channel)
    has_expand = expand_ratio != 1
    hidden = c_in * expand_ratio

    kind = _device_kind()
    ew_bf16 = _use_bf16_elementwise(kind)
    ew_dtype = jnp.bfloat16 if ew_bf16 else jnp.float32

    # kernel_size=1, padding=0, stride=s depthwise conv == spatial
    # subsampling; every preceding op is pointwise, so subsampling first is
    # exact and matches floor((h-1)/s)+1 output spatial size.
    if stride != 1:
        x = x[:, :, ::stride, ::stride]
        n, c_in, h, w = x.shape
    px = h * w

    # ---- one-time parameter prep (fold BN, orient weights, pad, cast) ----
    s2, b2 = _fold_bn(*params["bn2"])
    a3, c3 = _fold_bn(*params["bn3"])
    a2 = params["dw"] * s2                  # depthwise weight folded into BN2
    c2 = b2

    w3 = params["w3"] * a3[:, None]         # (c_out, hidden), BN3 folded in
    if has_expand:
        a1, c1 = _fold_bn(*params["bn1"])
        w1 = params["w1"] * a1[:, None]     # (hidden, c_in), BN1 folded in
        # Pad hidden to a multiple of 16 (bf16 sublane tiling). Exact: padded
        # rows stay 0 through ReLU6 and meet zero columns in w3.
        hp = ((hidden + 15) // 16) * 16
        if hp != hidden:
            ph = hp - hidden
            w1 = jnp.pad(w1, ((0, ph), (0, 0)))
            w3 = jnp.pad(w3, ((0, 0), (0, ph)))
            c1 = jnp.pad(c1, (0, ph))
            a2 = jnp.pad(a2, (0, ph))
            c2 = jnp.pad(c2, (0, ph))
        w1 = w1.astype(jnp.bfloat16)
    else:
        hp = hidden                         # == c_in, must match x's channels
    w3 = w3.astype(jnp.bfloat16)

    col = lambda v, dt: v.reshape(-1, 1).astype(dt)

    # No wrapper-side cast: x keeps its dtype (reshape merges the contiguous
    # trailing dims, no HBM pass); the bf16 cast for the MXU happens in VMEM.
    x3 = x.reshape(n, c_in, px)

    nb, tile_px = _plan_blocks(n, px, c_in, hp, out_channel,
                               jnp.dtype(x.dtype).itemsize,
                               jnp.dtype(out_dtype).itemsize,
                               2 if ew_bf16 else 4)
    num_px_tiles = pl.cdiv(px, tile_px)

    kernel = functools.partial(_inverted_residual_kernel, nb=nb,
                               use_shortcut=use_shortcut,
                               has_expand=has_expand, ew_dtype=ew_dtype)

    const = lambda i, j: (0, 0)   # constant-index weight/vector inputs
    # TODO(synk): on v7x, set pipeline_mode=pl.Buffered(1) on the
    # constant-index specs below to drop their redundant second buffer
    # (~1 MiB headroom on the widest blocks); left off here because
    # single-buffer pipeline_mode support varies across JAX versions and the
    # 20 MiB tile budget already leaves ample headroom under v7x's 64 MiB.

    in_specs = [pl.BlockSpec((nb, c_in, tile_px), lambda i, j: (i, 0, j))]  # x
    operands = [x3]
    if has_expand:
        in_specs += [pl.BlockSpec((hp, c_in), const),       # w1 (bf16)
                     pl.BlockSpec((hp, 1), const)]          # c1
        operands += [w1, col(c1, ew_dtype)]
    in_specs += [pl.BlockSpec((hp, 1), const),               # a2
                 pl.BlockSpec((hp, 1), const),               # c2
                 pl.BlockSpec((out_channel, hp), const),     # w3 (bf16)
                 pl.BlockSpec((out_channel, 1), const)]      # c3
    operands += [col(a2, ew_dtype), col(c2, ew_dtype), w3, col(c3, jnp.float32)]

    out3 = pl.pallas_call(
        kernel,
        out_shape=jax.ShapeDtypeStruct((n, out_channel, px), out_dtype),
        grid=(n // nb, num_px_tiles),
        in_specs=in_specs,
        out_specs=pl.BlockSpec((nb, out_channel, tile_px),
                               lambda i, j: (i, 0, j)),
        compiler_params=pltpu.CompilerParams(
            dimension_semantics=("parallel", "parallel"),
            vmem_limit_bytes=_vmem_limit_bytes(kind)),
    )(*operands)

    return out3.reshape(n, out_channel, h, w)


# --------------------------------------------------------------------------
# pure-JAX reference (mirrors the kernel's math: eval-mode BN, bf16 matmul
# operands, elementwise chain in the same dtype the kernel uses)
# --------------------------------------------------------------------------
def _reference(x, params, *, stride, expand_ratio, out_channel, ew_bf16):
    n, c_in, h, w = x.shape
    use_shortcut = (stride == 1) and (c_in == out_channel)
    xs = x[:, :, ::stride, ::stride] if stride != 1 else x
    ew = jnp.bfloat16 if ew_bf16 else jnp.float32
    hi = jax.lax.Precision.HIGHEST

    s2, b2 = _fold_bn(*params["bn2"])
    a3, c3 = _fold_bn(*params["bn3"])
    a2 = params["dw"] * s2

    def colb(v):
        return v.astype(ew)[None, :, None, None]

    if expand_ratio != 1:
        a1, c1 = _fold_bn(*params["bn1"])
        w1 = (params["w1"] * a1[:, None]).astype(jnp.bfloat16).astype(jnp.float32)
        xb = xs.astype(jnp.bfloat16).astype(jnp.float32)
        y = jnp.einsum("oc,nchw->nohw", w1, xb, precision=hi)
        y = y.astype(ew) + colb(c1)
        y = jnp.minimum(jnp.maximum(y, 0), 6)
    else:
        y = xs.astype(ew)
    y = y * colb(a2) + colb(b2)
    y = jnp.minimum(jnp.maximum(y, 0), 6)

    w3 = (params["w3"] * a3[:, None]).astype(jnp.bfloat16).astype(jnp.float32)
    yb = y.astype(jnp.bfloat16).astype(jnp.float32)
    z = jnp.einsum("oc,nchw->nohw", w3, yb, precision=hi) + c3[None, :, None, None]
    if use_shortcut:
        z = z + xs.astype(jnp.float32)
    return z.astype(x.dtype)


def make_params(key, in_channel, out_channel, expand_ratio):
    hidden = in_channel * expand_ratio
    ks = jax.random.split(key, 6)
    f = jnp.float32

    def bn(k, c):
        kg, kb, km, kv = jax.random.split(k, 4)
        return (1.0 + 0.1 * jax.random.normal(kg, (c,), f),    # gamma
                0.1 * jax.random.normal(kb, (c,), f),           # beta
                0.1 * jax.random.normal(km, (c,), f),           # running_mean
                1.0 + 0.1 * jax.random.uniform(kv, (c,), f))    # running_var

    p = {
        # PyTorch (out, in) orientation, 1x1 kernels squeezed
        "dw": 0.5 + 0.2 * jax.random.normal(ks[1], (hidden,), f),
        "w3": 0.2 * jax.random.normal(ks[2], (out_channel, hidden), f),
        "bn2": bn(ks[4], hidden),
        "bn3": bn(ks[5], out_channel),
    }
    if expand_ratio != 1:
        p["w1"] = 0.2 * jax.random.normal(ks[0], (hidden, in_channel), f)
        p["bn1"] = bn(ks[3], hidden)
    return p


if __name__ == "__main__":
    key = jax.random.PRNGKey(0)
    kx1, kp1, kx2, kp2 = jax.random.split(key, 4)
    ew_bf16 = _use_bf16_elementwise(_device_kind())
    tol = dict(atol=3e-2, rtol=3e-2)   # bf16 elementwise / matmul operands

    # Case 1: expand block with shortcut (stride=1, in==out, expand=6).
    N, C, H, W = 2, 4, 16, 16
    x1 = jax.random.normal(kx1, (N, C, H, W), jnp.float32)
    p1 = make_params(kp1, C, C, 6)
    o1 = jax.block_until_ready(
        inverted_residual(x1, p1, stride=1, expand_ratio=6, out_channel=C))
    r1 = _reference(x1, p1, stride=1, expand_ratio=6, out_channel=C,
                    ew_bf16=ew_bf16)
    assert o1.shape == (N, C, H, W)
    assert jnp.allclose(o1, r1, **tol), "expand block mismatch vs reference"

    # Case 2: expand_ratio == 1 (no expand conv: depthwise+BN+ReLU6, project,
    # BN still apply), stride=2 -> no shortcut, small spatial path.
    C2 = 8
    x2 = jax.random.normal(kx2, (N, C2, H, W), jnp.float32)
    p2 = make_params(kp2, C2, C2, 1)
    o2 = jax.block_until_ready(
        inverted_residual(x2, p2, stride=2, expand_ratio=1, out_channel=C2))
    r2 = _reference(x2, p2, stride=2, expand_ratio=1, out_channel=C2,
                    ew_bf16=ew_bf16)
    assert o2.shape == (N, C2, H // 2, W // 2)
    assert jnp.allclose(o2, r2, **tol), "expand_ratio=1 block mismatch"

    print("KERNEL_OK")
</pallas_src>

<mosaic_0001>
module attributes {stable_mosaic.version = 11 : i64} {
  func.func @_inverted_residual_kernel(%arg0: i32, %arg1: i32, %arg2: memref<1x4x256xf32, #tpu.memory_space<vmem>>, %arg3: memref<32x4xbf16, #tpu.memory_space<vmem>>, %arg4: memref<32x1xbf16, #tpu.memory_space<vmem>>, %arg5: memref<32x1xbf16, #tpu.memory_space<vmem>>, %arg6: memref<32x1xbf16, #tpu.memory_space<vmem>>, %arg7: memref<4x32xbf16, #tpu.memory_space<vmem>>, %arg8: memref<4x1xf32, #tpu.memory_space<vmem>>, %arg9: memref<1x4x256xf32, #tpu.memory_space<vmem>>) attributes {dimension_semantics = [#tpu.dimension_semantics<parallel>, #tpu.dimension_semantics<parallel>], iteration_bounds = array<i64: 2, 1>, scalar_prefetch = 0 : i64, scratch_operands = 0 : i64, tpu.core_type = #tpu.core_type<tc>, window_params = [{transform_indices = @transform_0, window_bounds = array<i64: 1, 4, 256>}, {pipeline_mode = #tpu.pipeline_mode<synchronous>, transform_indices = @transform_1, window_bounds = array<i64: 32, 4>}, {pipeline_mode = #tpu.pipeline_mode<synchronous>, transform_indices = @transform_2, window_bounds = array<i64: 32, 1>}, {pipeline_mode = #tpu.pipeline_mode<synchronous>, transform_indices = @transform_3, window_bounds = array<i64: 32, 1>}, {pipeline_mode = #tpu.pipeline_mode<synchronous>, transform_indices = @transform_4, window_bounds = array<i64: 32, 1>}, {pipeline_mode = #tpu.pipeline_mode<synchronous>, transform_indices = @transform_5, window_bounds = array<i64: 4, 32>}, {pipeline_mode = #tpu.pipeline_mode<synchronous>, transform_indices = @transform_6, window_bounds = array<i64: 4, 1>}, {transform_indices = @transform_7, window_bounds = array<i64: 1, 4, 256>}]} {
    %c0 = arith.constant 0 : index
    %c0_0 = arith.constant 0 : index
    %0 = vector.load %arg3[%c0, %c0_0] : memref<32x4xbf16, #tpu.memory_space<vmem>>, vector<32x4xbf16>
    %c0_1 = arith.constant 0 : index
    %c0_2 = arith.constant 0 : index
    %1 = vector.load %arg4[%c0_1, %c0_2] : memref<32x1xbf16, #tpu.memory_space<vmem>>, vector<32x1xbf16>
    %c0_3 = arith.constant 0 : index
    %c0_4 = arith.constant 0 : index
    %2 = vector.load %arg5[%c0_3, %c0_4] : memref<32x1xbf16, #tpu.memory_space<vmem>>, vector<32x1xbf16>
    %c0_5 = arith.constant 0 : index
    %c0_6 = arith.constant 0 : index
    %3 = vector.load %arg6[%c0_5, %c0_6] : memref<32x1xbf16, #tpu.memory_space<vmem>>, vector<32x1xbf16>
    %c0_7 = arith.constant 0 : index
    %c0_8 = arith.constant 0 : index
    %4 = vector.load %arg7[%c0_7, %c0_8] : memref<4x32xbf16, #tpu.memory_space<vmem>>, vector<4x32xbf16>
    %c0_9 = arith.constant 0 : index
    %c0_10 = arith.constant 0 : index
    %5 = vector.load %arg8[%c0_9, %c0_10] : memref<4x1xf32, #tpu.memory_space<vmem>>, vector<4x1xf32>
    %c0_11 = arith.constant 0 : index
    %c0_12 = arith.constant 0 : index
    %c0_13 = arith.constant 0 : index
    %6 = vector.load %arg2[%c0_11, %c0_12, %c0_13] : memref<1x4x256xf32, #tpu.memory_space<vmem>>, vector<1x4x256xf32>
    %7 = vector.shape_cast %6 : vector<1x4x256xf32> to vector<4x256xf32>
    %8 = arith.truncf %7 : vector<4x256xf32> to vector<4x256xbf16>
    %cst = arith.constant dense<0.000000e+00> : vector<32x256xf32>
    %9 = tpu.matmul %0, %8, %cst {dimension_numbers = #tpu.dot_dimension_numbers<[1], [0], [0], [1], [0, 0, 1, 1], [], []>} : vector<32x4xbf16>, vector<4x256xbf16>, vector<32x256xf32> -> vector<32x256xf32>
    %10 = arith.truncf %9 : vector<32x256xf32> to vector<32x256xbf16>
    %11 = vector.broadcast %1 : vector<32x1xbf16> to vector<32x256xbf16>
    %12 = arith.addf %10, %11 : vector<32x256xbf16>
    %cst_14 = arith.constant 0.000000e+00 : bf16
    %13 = vector.broadcast %cst_14 : bf16 to vector<32x256xbf16>
    %14 = arith.maximumf %12, %13 : vector<32x256xbf16>
    %cst_15 = arith.constant 6.000000e+00 : bf16
    %15 = vector.broadcast %cst_15 : bf16 to vector<32x256xbf16>
    %16 = arith.minimumf %14, %15 : vector<32x256xbf16>
    %17 = vector.broadcast %2 : vector<32x1xbf16> to vector<32x256xbf16>
    %18 = arith.mulf %16, %17 : vector<32x256xbf16>
    %19 = vector.broadcast %3 : vector<32x1xbf16> to vector<32x256xbf16>
    %20 = arith.addf %18, %19 : vector<32x256xbf16>
    %cst_16 = arith.constant 0.000000e+00 : bf16
    %21 = vector.broadcast %cst_16 : bf16 to vector<32x256xbf16>
    %22 = arith.maximumf %20, %21 : vector<32x256xbf16>
    %cst_17 = arith.constant 6.000000e+00 : bf16
    %23 = vector.broadcast %cst_17 : bf16 to vector<32x256xbf16>
    %24 = arith.minimumf %22, %23 : vector<32x256xbf16>
    %cst_18 = arith.constant dense<0.000000e+00> : vector<4x256xf32>
    %25 = tpu.matmul %4, %24, %cst_18 {dimension_numbers = #tpu.dot_dimension_numbers<[1], [0], [0], [1], [0, 0, 1, 1], [], []>} : vector<4x32xbf16>, vector<32x256xbf16>, vector<4x256xf32> -> vector<4x256xf32>
    %26 = vector.broadcast %5 : vector<4x1xf32> to vector<4x256xf32>
    %27 = arith.addf %25, %26 : vector<4x256xf32>
    %28 = arith.addf %27, %7 : vector<4x256xf32>
    %c0_19 = arith.constant 0 : index
    %c0_20 = arith.constant 0 : index
    %c0_21 = arith.constant 0 : index
    %29 = vector.load %arg9[%c0_19, %c0_20, %c0_21] : memref<1x4x256xf32, #tpu.memory_space<vmem>>, vector<1x4x256xf32>
    %30 = vector.shape_cast %29 : vector<1x4x256xf32> to vector<4x256xf32>
    %31 = vector.shape_cast %28 : vector<4x256xf32> to vector<1x4x256xf32>
    tpu.vector_store %arg9[%c0_19, %c0_20, %c0_21], %31 {strides = array<i32>} : memref<1x4x256xf32, #tpu.memory_space<vmem>>, vector<1x4x256xf32>,
    return
  }
  func.func @transform_0(%arg0: i32, %arg1: i32) -> (i32, i32, i32) {
    %c0_i32 = arith.constant 0 : i32
    %c0_i32_0 = arith.constant 0 : i32
    return %arg0, %c0_i32, %arg1 : i32, i32, i32
  }
  func.func @transform_1(%arg0: i32, %arg1: i32) -> (i32, i32) {
    %c0_i32 = arith.constant 0 : i32
    %c0_i32_0 = arith.constant 0 : i32
    %c0_i32_1 = arith.constant 0 : i32
    return %c0_i32, %c0_i32_0 : i32, i32
  }
  func.func @transform_2(%arg0: i32, %arg1: i32) -> (i32, i32) {
    %c0_i32 = arith.constant 0 : i32
    %c0_i32_0 = arith.constant 0 : i32
    %c0_i32_1 = arith.constant 0 : i32
    return %c0_i32, %c0_i32_0 : i32, i32
  }
  func.func @transform_3(%arg0: i32, %arg1: i32) -> (i32, i32) {
    %c0_i32 = arith.constant 0 : i32
    %c0_i32_0 = arith.constant 0 : i32
    %c0_i32_1 = arith.constant 0 : i32
    return %c0_i32, %c0_i32_0 : i32, i32
  }
  func.func @transform_4(%arg0: i32, %arg1: i32) -> (i32, i32) {
    %c0_i32 = arith.constant 0 : i32
    %c0_i32_0 = arith.constant 0 : i32
    %c0_i32_1 = arith.constant 0 : i32
    return %c0_i32, %c0_i32_0 : i32, i32
  }
  func.func @transform_5(%arg0: i32, %arg1: i32) -> (i32, i32) {
    %c0_i32 = arith.constant 0 : i32
    %c0_i32_0 = arith.constant 0 : i32
    %c0_i32_1 = arith.constant 0 : i32
    return %c0_i32, %c0_i32_0 : i32, i32
  }
  func.func @transform_6(%arg0: i32, %arg1: i32) -> (i32, i32) {
    %c0_i32 = arith.constant 0 : i32
    %c0_i32_0 = arith.constant 0 : i32
    %c0_i32_1 = arith.constant 0 : i32
    return %c0_i32, %c0_i32_0 : i32, i32
  }
  func.func @transform_7(%arg0: i32, %arg1: i32) -> (i32, i32, i32) {
    %c0_i32 = arith.constant 0 : i32
    %c0_i32_0 = arith.constant 0 : i32
    return %arg0, %c0_i32, %arg1 : i32, i32, i32
  }
}

</mosaic_0001>

<bundles_post_ra>
// kernel: tpu_custom_call.1
= control target key start
LH: loop header
LB: loop body
LE: loop exit
PB: predicated region body
PF: predicated region fallthrough
CT: control target
= control target key end

     0   :  { %s1827_s0 = inlined_call_operand.hbm [shape: f32[2,4,256], index: 0, kind: input, shape index: {}]   ;;  %s1828_s1 = inlined_call_operand.hbm [shape: bf16[32,4], index: 1, kind: input, shape index: {}]   ;;  %s1829_s2 = inlined_call_operand.hbm [shape: bf16[32,1], index: 2, kind: input, shape index: {}]   ;;  %s1830_s3 = inlined_call_operand.hbm [shape: bf16[32,1], index: 3, kind: input, shape index: {}]   ;;  %s1831_s4 = inlined_call_operand.hbm [shape: bf16[32,1], index: 4, kind: input, shape index: {}]   ;;  %s1832_s5 = inlined_call_operand.hbm [shape: bf16[4,32], index: 5, kind: input, shape index: {}]   ;;  %s1833_s6 = inlined_call_operand.hbm [shape: f32[4,1], index: 6, kind: input, shape index: {}]   ;;  %s1834_s7 = inlined_call_operand.hbm [shape: f32[2,4,256], index: 7, kind: output, shape index: {}]  }
   0x1   :  { %1843 = sst [smem:[#allocation20_spill]] %s1828_s1 }
   0x2   :  { %1844 = sst [smem:[#allocation21_spill]] %s1834_s7 }
   0x3   :  { %12 = vsyncpa [#allocation3], 0 }
   0x4   :  { %14 = vsyncpa [#allocation3 + $0x1], 0 }
   0x5   :  { %15 = vsyncpa [#allocation6], 0 }
   0x6   :  { %16 = vsyncpa [#allocation9], 0 }
   0x7   :  { %17 = vsyncpa [#allocation12], 0 }
   0x8   :  { %18 = vsyncpa [#allocation4], 0 }
   0x9   :  { %20 = vsyncpa [#allocation4 + $0x1], 0  ;;  %s1449_s24 = smov 0   ;;  %s1451_s25 = smov 0  }
   0xa   :  { %s1453_s26 = smov 0   ;;  %s1455_s27 = smov 0  }
   0xb   :  { %s1457_s28 = smov 0   ;;  %s1459_s29 = smov 0  }
   0xc LB: > { %s1835_s30 = sadd.s32 4294967295, %s1394_s29   ;;  %p930_p0 = scmp.ge.s32.totalorder %s1394_s29, 1  ;;  %s1394_s29 = sphi %s1459_s29, %s26_s29   ;;  %s1390_s28 = sphi %s1457_s28, %s1868_s28   ;;  %s1386_s27 = sphi %s1455_s27, %s1867_s27   ;;  %s1382_s26 = sphi %s1453_s26, %s1866_s26   ;;  %s1378_s25 = sphi %s1451_s25, %s1865_s25   ;;  %s1374_s24 = sphi %s1449_s24, %s1864_s24  }
   0xd   : > { %p1483_p1 = scmp.eq.s32.totalorder %s1835_s30, 0  ;;  %p225_p2 = scmp.lt.s32.totalorder %s1394_s29, 3 }
   0xe   : > { %s1396_s10 = smov [#allocation5]   ;;  %s1397_s13 = smov [#allocation8]  }
   0xf   : > { %s1845_s8 = scalar_select %p1483_p1, 1, 0 }
  0x10   : > { %p1488_p3 = pnand %p930_p0, %p225_p2  ;;  %s237_s11 = sshll.u32 %s1396_s10, 4  ;;  %s1492_s11 = int_to_ptr.vmem [resolvable:$true] %s237_s11 }
  0x11   : > { %s263_s14 = sshll.u32 %s1397_s13, 4  ;;  %s1398_s15 = smov [#allocation11]   ;;  %s1503_s14 = int_to_ptr.vmem [resolvable:$true] %s263_s14 }
  0x12   : > { %s1846_s9 = scalar_select %p1488_p3, 1, 0 }
  0x13   : > { %p997_p4 = pneg %p1488_p3  ;;  %s1505_s16 = sshll.u32 %s1398_s15, 4  ;;  %s291_s16 = int_to_ptr.vmem [resolvable:$true] %s1505_s16 }
  0x14   : > { %s1848_s1 = sld [smem:[#allocation20_spill]] }
  0x15   : > { %p1499_p6 = pnand %p997_p4, %p1483_p1 }
  0x17   : > { %p1515_p8 = pneg %p1499_p6 }
  0x1a   : > { %s1102_s19 = scalar_lea.hbm %s1848_s1, 256 }
  0x1b   : > { %p1103_p7 = scmp.ne.s32.totalorder %s1848_s1, %s1102_s19  ;;  %p1109_p11 = scmp.lt.u32.totalorder %s1102_s19, %s1848_s1 }
  0x1d   : > { %p1105_p9 = pnand %p1515_p8, %p1103_p7 }
  0x1f   : > { %p1106_p10 = pneg %p1105_p9 }
  0x21   : > { %p1111_p12 = pnand %p1109_p11, %p1106_p10 }
  0x23   : > { %1114 = shalt.err (!%p1111_p12)
}
  0x24   : > { %s1115_s13 = scalar_lea.vmem %s1492_s11, 256  ;;  %p1123_p4 = scmp.lt.s32.totalorder %s1492_s11, %s1492_s11 }
  0x25   : > { %p1116_p13 = scmp.ne.s32.totalorder %s1492_s11, %s1115_s13  ;;  %p1124_p5 = scmp.lt.s32.totalorder %s1115_s13, %s1115_s13 }
  0x27   : > { %p1118_p0 = pnand %p1116_p13, %p1515_p8  ;;  %p1125_p7 = por %p1124_p5, %p1123_p4 }
  0x29   : > { %p1119_p2 = pneg %p1118_p0 }
  0x2b   : > { %p1126_p9 = pnand %p1125_p7, %p1119_p2 }
  0x2d   : > { %1129 = shalt.err (!%p1126_p9)
}
  0x2e   : > { %s1840_s15 = smov 64   ;;  %s1400_s17 = smov 4  }
  0x2f   : > { %1000 = dma.hbm_to_vmem [thread:$0]  (!%p1499_p6), %s1848_s1, 256, %s1492_s11, [#allocation6], %s1840_s15, %s1840_s15, %s1400_s17  }
  0x30   : > { %s1130_s23 = scalar_lea.hbm %s1830_s3, 256 }
  0x31   : > { %p1131_p5 = scmp.ne.s32.totalorder %s1830_s3, %s1130_s23  ;;  %p1137_p12 = scmp.lt.u32.totalorder %s1130_s23, %s1830_s3 }
  0x33   : > { %p1133_p10 = pnand %p1131_p5, %p1515_p8 }
  0x35   : > { %p1134_p11 = pneg %p1133_p10 }
  0x37   : > { %p1139_p13 = pnand %p1137_p12, %p1134_p11 }
  0x39   : > { %1142 = shalt.err (!%p1139_p13)
}
  0x3a   : > { %s1143_s11 = scalar_lea.vmem %s1503_s14, 256  ;;  %p1151_p7 = scmp.lt.s32.totalorder %s1503_s14, %s1503_s14 }
  0x3b   : > { %p1144_p0 = scmp.ne.s32.totalorder %s1503_s14, %s1143_s11  ;;  %p1152_p9 = scmp.lt.s32.totalorder %s1143_s11, %s1143_s11 }
  0x3d   : > { %p1146_p2 = pnand %p1144_p0, %p1515_p8  ;;  %p1153_p5 = por %p1152_p9, %p1151_p7 }
  0x3f   : > { %p1147_p4 = pneg %p1146_p2 }
  0x41   : > { %p1154_p10 = pnand %p1153_p5, %p1147_p4 }
  0x43   : > { %1157 = shalt.err (!%p1154_p10)
}
  0x44   : > { %1006 = dma.hbm_to_vmem [thread:$0]  (!%p1499_p6), %s1830_s3, 256, %s1503_s14, [#allocation9], %s1840_s15, %s1840_s15, %s1400_s17  }
  0x45   : > { %s1158_s20 = scalar_lea.hbm %s1832_s5, 32 }
  0x46   : > { %p1159_p11 = scmp.ne.s32.totalorder %s1832_s5, %s1158_s20  ;;  %p1165_p0 = scmp.lt.u32.totalorder %s1158_s20, %s1832_s5 }
  0x48   : > { %p1161_p12 = pnand %p1159_p11, %p1515_p8 }
  0x4a   : > { %p1162_p13 = pneg %p1161_p12 }
  0x4c   : > { %p1167_p2 = pnand %p1165_p0, %p1162_p13 }
  0x4e   : > { %1170 = shalt.err (!%p1167_p2)
}
  0x4f   : > { %s1171_s11 = scalar_lea.vmem %s291_s16, 32  ;;  %p1179_p5 = scmp.lt.s32.totalorder %s291_s16, %s291_s16 }
  0x50   : > { %p1172_p4 = scmp.ne.s32.totalorder %s291_s16, %s1171_s11  ;;  %p1180_p10 = scmp.lt.s32.totalorder %s1171_s11, %s1171_s11 }
  0x52   : > { %p1174_p7 = pnand %p1172_p4, %p1515_p8  ;;  %p1181_p3 = por %p1180_p10, %p1179_p5 }
  0x54   : > { %p1175_p9 = pneg %p1174_p7 }
  0x56   : > { %p1182_p1 = pnand %p1181_p3, %p1175_p9 }
  0x58   : > { %1185 = shalt.err (!%p1182_p1)
}
  0x59   : > { %1012 = dma.hbm_to_vmem [thread:$0]  (!%p1499_p6), %s1832_s5, 32, %s291_s16, [#allocation12]  }
  0x5a   : > { %s1401_s30 = smov [#allocation7]   ;;  %s1402_s19 = smov [#allocation10]  }
  0x5b   : > { %s250_s18 = sshll.u32 %s1401_s30, 4  ;;  %s276_s20 = sshll.u32 %s1402_s19, 4  ;;  %s251_s18 = int_to_ptr.vmem [resolvable:$true] %s250_s18  ;;  %s277_s20 = int_to_ptr.vmem [resolvable:$true] %s276_s20 }
  0x5c   : > { %s1186_s10 = scalar_lea.hbm %s1829_s2, 256 }
  0x5d   : > { %p1187_p1 = scmp.ne.s32.totalorder %s1829_s2, %s1186_s10  ;;  %p1193_p12 = scmp.lt.u32.totalorder %s1186_s10, %s1829_s2 }
  0x5f   : > { %p1189_p3 = pnand %p1187_p1, %p1515_p8 }
  0x61   : > { %p1190_p11 = pneg %p1189_p3 }
  0x63   : > { %p1195_p13 = pnand %p1193_p12, %p1190_p11 }
  0x65   : > { %1198 = shalt.err (!%p1195_p13)
}
  0x66   : > { %s1199_s16 = scalar_lea.vmem %s251_s18, 256  ;;  %p1207_p7 = scmp.lt.s32.totalorder %s251_s18, %s251_s18 }
  0x67   : > { %p1200_p0 = scmp.ne.s32.totalorder %s251_s18, %s1199_s16  ;;  %p1208_p9 = scmp.lt.s32.totalorder %s1199_s16, %s1199_s16 }
  0x69   : > { %p1202_p2 = pnand %p1200_p0, %p1515_p8  ;;  %p1209_p5 = por %p1208_p9, %p1207_p7 }
  0x6b   : > { %p1203_p4 = pneg %p1202_p2 }
  0x6d   : > { %p1210_p10 = pnand %p1209_p5, %p1203_p4 }
  0x6f   : > { %1213 = shalt.err (!%p1210_p10)
}
  0x70   : > { %s1850_s7 = smov 64   ;;  %s1214_s23 = scalar_lea.hbm %s1831_s4, 256 }
  0x71   : > { %1003 = dma.hbm_to_vmem [thread:$0]  (!%p1499_p6), %s1829_s2, 256, %s251_s18, [#allocation6], %s1850_s7, %s1850_s7, %s1400_s17  }
  0x72   : > { %p1215_p1 = scmp.ne.s32.totalorder %s1831_s4, %s1214_s23  ;;  %p1221_p12 = scmp.lt.u32.totalorder %s1214_s23, %s1831_s4 }
  0x74   : > { %p1217_p3 = pnand %p1215_p1, %p1515_p8 }
  0x76   : > { %p1218_p11 = pneg %p1217_p3 }
  0x78   : > { %p1223_p13 = pnand %p1221_p12, %p1218_p11 }
  0x7a   : > { %1226 = shalt.err (!%p1223_p13)
}
  0x7b   : > { %s1227_s16 = scalar_lea.vmem %s277_s20, 256  ;;  %p1235_p7 = scmp.lt.s32.totalorder %s277_s20, %s277_s20 }
  0x7c   : > { %p1228_p0 = scmp.ne.s32.totalorder %s277_s20, %s1227_s16  ;;  %p1236_p9 = scmp.lt.s32.totalorder %s1227_s16, %s1227_s16 }
  0x7e   : > { %p1230_p2 = pnand %p1228_p0, %p1515_p8  ;;  %p1237_p5 = por %p1236_p9, %p1235_p7 }
  0x80   : > { %p1231_p4 = pneg %p1230_p2 }
  0x82   : > { %p1238_p10 = pnand %p1237_p5, %p1231_p4 }
  0x84   : > { %1241 = shalt.err (!%p1238_p10)
}
  0x85   : > { %1009 = dma.hbm_to_vmem [thread:$0]  (!%p1499_p6), %s1831_s4, 256, %s277_s20, [#allocation9], %s1850_s7, %s1850_s7, %s1400_s17  }
  0x86   : > { %s1403_s30 = smov [#allocation13]   ;;  %s1242_s10 = scalar_lea.hbm %s1833_s6, 64 }
  0x87   : > { %s301_s19 = sshll.u32 %s1403_s30, 4  ;;  %p1243_p1 = scmp.ne.s32.totalorder %s1833_s6, %s1242_s10  ;;  %s302_s19 = int_to_ptr.vmem [resolvable:$true] %s301_s19 }
  0x88   : > { %p1249_p12 = scmp.lt.u32.totalorder %s1242_s10, %s1833_s6 }
  0x89   : > { %p1245_p3 = pnand %p1243_p1, %p1515_p8 }
  0x8b   : > { %p1246_p11 = pneg %p1245_p3 }
  0x8d   : > { %p1251_p13 = pnand %p1249_p12, %p1246_p11 }
  0x8f   : > { %1254 = shalt.err (!%p1251_p13)
}
  0x90   : > { %s1255_s17 = scalar_lea.vmem %s302_s19, 64  ;;  %p1263_p7 = scmp.lt.s32.totalorder %s302_s19, %s302_s19 }
  0x91   : > { %p1256_p0 = scmp.ne.s32.totalorder %s302_s19, %s1255_s17  ;;  %p1264_p9 = scmp.lt.s32.totalorder %s1255_s17, %s1255_s17 }
  0x93   : > { %p1258_p2 = pnand %p1256_p0, %p1515_p8  ;;  %p1265_p5 = por %p1264_p9, %p1263_p7 }
  0x95   : > { %p1259_p4 = pneg %p1258_p2 }
  0x97   : > { %p1266_p10 = pnand %p1265_p5, %p1259_p4 }
  0x99   : > { %1269 = shalt.err (!%p1266_p10)
}
  0x9a   : > { %1015 = dma.hbm_to_vmem [thread:$0]  (!%p1499_p6), %s1833_s6, 64, %s302_s19, [#allocation12]  }
  0x9b   : > { %s929_s22 = sadd.s32 4294967294, %s1394_s29   ;;  %s38_s18 = sadd.s32 1, %s1390_s28 }
  0x9c   : > { %p40_p8 = scmp.ge.s32.totalorder %s38_s18, 2  ;;  %s47_s12 = sadd.s32 1, %s1382_s26 }
  0x9d   : > { %p54_p1 = scmp.ne.s32.totalorder %s1382_s26, %s1378_s25  ;;  %p55_p3 = scmp.eq.s32.totalorder %s1394_s29, 0 }
  0x9e   : > { %s1870_s18 = smov (%p40_p8, %s38_s18), 0  ;;  %p60_p12 = scmp.ne.s32.totalorder %s1378_s25, %s1374_s24 }
  0x9f   : > { %p1652_p11 = por %p55_p3, %p54_p1  ;;  %s42_s30 = ssub.s32 %s1390_s28, %s1870_s18 }
  0xa0   : > { %s1852_s19 = sadd.s32 4294967295, %s1394_s29   ;;  %p45_p13 = scmp.eq.s32.totalorder %s42_s30, 0 }
  0xa1   : > { %p212_p6 = scmp.eq.s32.totalorder %s1852_s19, 1  ;;  %p1853_p0 = scmp.ne.s32.totalorder %s1845_s8, 0 }
  0xa2   : > { %p218_p7 = scmp.eq.s32.totalorder %s929_s22, 1  ;;  %p1030_p5 = scmp.lt.s32.totalorder %s1394_s29, 2 }
  0xa3   : > { %p1664_p2 = por %p1853_p0, %p60_p12  ;;  %p1668_p4 = por %p212_p6, %p54_p1 }
  0xa4   : > { %s1673_s10 = scalar_select %p45_p13, %s1382_s26, %s47_s12  }
  0xa5   : > { %s1855_s23 = scalar_select %p1668_p4, 1, 0 }
  0xa6   : > { %p1675_p9 = por %p218_p7, %p60_p12  ;;  %s312_s11 = sand.u32 1, %s1382_s26  }
  0xa7   : > { %s967_s14 = sshll.u32 %s1390_s28, 7  ;;  %s938_s16 = sshll.u32 %s312_s11, 3 }
  0xa8   : > { %s1856_s13 = scalar_select %p1675_p9, 1, 0 }
  0xa9   : > { %s1685_s7 = scalar_lea.hbm %s1827_s0, %s967_s14  ;;  %s316_s22 = scalar_lea.vmem [#allocation2], %s938_s16 }
  0xaa   : > { %s326_s12 = sshll.u32 %s316_s22, 4  ;;  %p1689_p10 = pnand %p1030_p5, %p1652_p11  ;;  %s1693_s12 = int_to_ptr.vmem [resolvable:$true] %s326_s12 }
  0xab   : > { %s313_s19 = scalar_lea.sflag [#allocation3], %s312_s11  ;;  %s1270_s1 = scalar_lea.hbm %s1685_s7, 128 }
  0xac   : > { %p1271_p8 = scmp.ne.s32.totalorder %s1685_s7, %s1270_s1  ;;  %p1272_p1 = pneg %p1689_p10 }
  0xad   : > { %s1275_s15 = scalar_lea.hbm %s1827_s0, 256  ;;  %p1276_p11 = scmp.lt.u32.totalorder %s1685_s7, %s1827_s0 }
  0xae   : > { %p1273_p3 = pnand %p1272_p1, %p1271_p8  ;;  %p1277_p6 = scmp.lt.u32.totalorder %s1275_s15, %s1270_s1 }
  0xaf   : > { %p1279_p0 = scmp.lt.u32.totalorder %s1270_s1, %s1685_s7 }
  0xb0   : > { %p1274_p12 = pneg %p1273_p3  ;;  %p1278_p13 = por %p1277_p6, %p1276_p11 }
  0xb2   : > { %p1280_p7 = por %p1279_p0, %p1278_p13 }
  0xb4   : > { %p1281_p5 = pnand %p1280_p7, %p1274_p12 }
  0xb6   : > { %1284 = shalt.err (!%p1281_p5)
}
  0xb7   : > { %s1285_s11 = scalar_lea.vmem %s1693_s12, 128  ;;  %s1404_s22 = smov [#allocation2]  }
  0xb8   : > { %p1286_p8 = scmp.ne.s32.totalorder %s1693_s12, %s1285_s11  ;;  %s1290_s14 = sshll.u32 %s1404_s22, 4  ;;  %s1291_s14 = int_to_ptr.vmem [resolvable:$false] %s1290_s14 }
  0xb9   : > { %s1292_s16 = scalar_lea.vmem %s1291_s14, 256  ;;  %p1293_p4 = scmp.lt.s32.totalorder %s1693_s12, %s1291_s14 }
  0xba   : > { %p1288_p3 = pnand %p1286_p8, %p1272_p1  ;;  %p1294_p11 = scmp.lt.s32.totalorder %s1292_s16, %s1285_s11 }
  0xbc   : > { %p1289_p9 = pneg %p1288_p3  ;;  %p1295_p6 = por %p1294_p11, %p1293_p4 }
  0xbe   : > { %p1296_p13 = pnand %p1295_p6, %p1289_p9 }
  0xc0   : > { %1299 = shalt.err (!%p1296_p13)
}
  0xc1   : > { %1019 = dma.hbm_to_vmem [thread:$0]  (!%p1689_p10), %s1685_s7, 128, %s1693_s12, %s313_s19  }
  0xc2   : > { %p1858_p12 = scmp.ne.s32.totalorder %s1846_s9, 0 }
  0xc3   : > { %s1723_s1 = sand.u32 (!%p1858_p12), 1, %s1378_s25  }
  0xc4   : > { %335 = sbr.rel (%p1858_p12) target bundleno = 696 (0x2b8), region = 48  ;;  %s942_s15 = sshll.u32 (!%p1858_p12), %s1723_s1, 3 }
  0xc5   : > { %s338_s17 = scalar_lea.sflag (!%p1858_p12), [#allocation3], %s1723_s1  ;;  %s341_s20 = scalar_lea.vmem (!%p1858_p12), [#allocation2], %s942_s15 }
  0xcb   : > { %1353 = dma.done.wait (%p1664_p2), %s338_s17, 128  }
  0xcc   : > { %1355 = vsyncadd (%p1664_p2), %s338_s17, 4294967168  ;;  %p1859_p4 = scmp.ne.s32.totalorder %s1845_s8, 0 }
  0xce   : > { %1357 = dma.done.wait (%p1859_p4), [#allocation6], 512  }
  0xcf   : > { %1359 = vsyncadd (%p1859_p4), [#allocation6], 4294966784 }
  0xd0   : > { %1361 = dma.done.wait (%p1859_p4), [#allocation9], 512  }
  0xd1   : > { %1363 = vsyncadd (%p1859_p4), [#allocation9], 4294966784 }
  0xd2   : > { %1365 = dma.done.wait (%p1859_p4), [#allocation12], 96  }
  0xd3   : > { %1367 = vsyncadd (%p1859_p4), [#allocation12], 4294967200  ;;  %v1405_v0 = vmov 0   ;;  %v1749_v1 = vld [vmem:[%s341_s20] sm:$0xff]  ;;  %vm441_vm0 = vcmask 1041408   ;;  %v1100_v10 = vld [vmem:[#allocation5] sm:$0xff]   ;;  %v513_v25 = vlaneseq }
  0xd4   : > { %480 = vmatprep.mubr.bf16.mxu0 %v1405_v0  ;;  %1097 = vset.pattern.permute.xlu0 %v1405_v0  ;;  %v1753_v2 = vcombine.high %v1749_v1, %v1749_v1  ;;  %v422_v3 = vpack.c.bf16 %v1749_v1, %v1749_v1  ;;  %v404_v4 = vld [vmem:[#allocation7] sm:$0xf]  ;;  %v406_v5 = vld [vmem:[#allocation7 + $0x8] sm:$0xf]  ;;  %v405_v8 = vld [vmem:[#allocation7 + $0x4] sm:$0xf] }
  0xd5   : > { %1098 = vset.pattern.permute.xlu1 %v1405_v0  ;;  %754 = vmatprep.mubr.bf16.mxu1 %v1405_v0  ;;  %v407_v9 = vld [vmem:[#allocation7 + $0xc] sm:$0xf]  ;;  %vm434_vm1 = vcmask 31744   ;;  %v408_v11 = vld [vmem:[#allocation8] sm:$0xf]  ;;  %v1101_v15 = vld [vmem:[#allocation5 + $0x8] sm:$0xff]  }
  0xd6   : > { %v423_v6 = vpack.c.bf16 %v1753_v2, %v1753_v2  ;;  %v443_v7 = vsel %vm441_vm0, %v422_v3, 0  ;;  %507 = vperm.xlu0 %1097, %v404_v4   ;;  %531 = vperm.xlu1 %1098, %v406_v5   ;;  %v409_v12 = vld [vmem:[#allocation8 + $0x4] sm:$0xf]  ;;  %v412_v13 = vld [vmem:[#allocation10] sm:$0xf]  ;;  %v514_v29 = vshrl.u32 %v513_v25, 7 }
  0xd7   : > { %v413_v14 = vld [vmem:[#allocation10 + $0x4] sm:$0xf]  ;;  %v410_v16 = vld [vmem:[#allocation8 + $0x8] sm:$0xf]  ;;  %v411_v17 = vld [vmem:[#allocation8 + $0xc] sm:$0xf] }
  0xd8   : > { %952 = vmatprep.subr.msk.bf16.mxu0 %vm441_vm0, %v423_v6  ;;  %v414_v18 = vld [vmem:[#allocation10 + $0x8] sm:$0xf]  ;;  %v415_v19 = vld [vmem:[#allocation10 + $0xc] sm:$0xf]  ;;  %v417_v20 = vld [vmem:[#allocation13] sm:$0xf] }
  0xd9   : > { %449 = vmatpush1.bf16.msra.mxu0 %v443_v7  ;;  %v1406_v23 = vmov 839922192   ;;  %v1407_v58 = vmov 1086341312   ;;  %vm718_vm2 = vcmask 261120   ;;  %s968_s8 = sshll.u32 %s1386_s27, 7 }
  0xda   : > { %519 = vperm.xlu0 %1097, %v405_v8   ;;  %543 = vperm.xlu1 %1098, %v407_v9   ;;  %v511_v24 = vunpack.c.l.s4 %v1406_v23  ;;  %s395_s9 = scalar_lea.vmem [#allocation14], %s942_s15  ;;  %s1860_s30 = sld [smem:[#allocation21_spill]] }
  0xdb   : > { %s787_s21 = sshll.u32 %s395_s9, 4  ;;  %s771_s11 = scalar_lea.sflag [#allocation4], %s1723_s1  ;;  %s1780_s21 = int_to_ptr.vmem [resolvable:$true] %s787_s21 }
  0xdc   : > { %953 = vmatmul.mubr.msk.bf16.vlgmr.msra.gmra.mrb[0].mxu0 %vm434_vm1, %v1100_v10  ;;  %v512_v28 = vunpack.c.0.s8 %v511_v24  ;;  %s1300_s22 = scalar_lea.vmem %s1780_s21, 128  ;;  %p1861_p9 = scmp.ne.s32.totalorder %s1855_s23, 0 }
  0xdd   : > { %490 = vmatprep.mubr.bf16.mxu0 %v1405_v0  ;;  %p1301_p2 = scmp.ne.s32.totalorder %s1780_s21, %s1300_s22  ;;  %s1408_s27 = smov [#allocation14]  }
  0xde   : > { %579 = vperm.xlu0 %1097, %v408_v11   ;;  %591 = vperm.xlu1 %1098, %v409_v12   ;;  %v515_v31 = vsub.s32 %v512_v28, %v514_v29  ;;  %s1304_s14 = sshll.u32 %s1408_s27, 4  ;;  %s1305_s14 = int_to_ptr.vmem [resolvable:$false] %s1304_s14 }
  0xdf   : > { %p1302_p10 = pnand %p1301_p2, %p1861_p9  ;;  %s1306_s16 = scalar_lea.vmem %s1305_s14, 256 }
  0xe0   : > { %s1778_s19 = scalar_lea.hbm %s1860_s30, %s968_s8  ;;  %p1307_p0 = scmp.lt.s32.totalorder %s1780_s21, %s1305_s14 }
  0xe1   : > { %p1303_p1 = pneg %p1302_p10  ;;  %p1308_p7 = scmp.lt.s32.totalorder %s1306_s16, %s1300_s22 }
  0xe2   : > { %643 = vperm.xlu0 %1097, %v412_v13   ;;  %655 = vperm.xlu1 %1098, %v413_v14  }
  0xe3   : > { %p1309_p5 = por %p1308_p7, %p1307_p0 }
  0xe4   : > { %954 = vmatmul.mubr.msk.bf16.gmra.mrb[4].mxu0 %vm434_vm1, %v1101_v15 }
  0xe5   : > { %p1310_p8 = pnand %p1309_p5, %p1303_p1 }
  0xe6   : > { %603 = vperm.xlu0 %1097, %v410_v16   ;;  %615 = vperm.xlu1 %1098, %v411_v17  }
  0xea   : > { %667 = vperm.xlu0 %1097, %v414_v18   ;;  %679 = vperm.xlu1 %1098, %v415_v19  }
  0xee   : > { %715 = vperm.xlu0 %1097, %v417_v20  }
 0x155   : > { %v532_v21 = vpop.permute.xlu1 %531  ;;  %v508_v22 = vpop.permute.xlu0 %507 }
 0x156   : > { %v516_v33 = vrot.slane %v508_v22, %v515_v31  ;;  %v540_v47 = vrot.slane %v532_v21, %v515_v31 }
 0x159   : > { %v544_v26 = vpop.permute.xlu1 %543  ;;  %v520_v27 = vpop.permute.xlu0 %519 }
 0x15a   : > { %v528_v34 = vrot.slane %v520_v27, %v515_v31  ;;  %v552_v50 = vrot.slane %v544_v26, %v515_v31 }
 0x15c   : > { %v955_v40 = vcombine.low %v516_v33, %v528_v34  ;;  %v956_v63 = vcombine.low %v540_v47, %v552_v50 }
 0x15d   : > { %v592_v30 = vpop.permute.xlu1 %591  ;;  %v580_v32 = vpop.permute.xlu0 %579 }
 0x15e   : > { %v588_v44 = vrot.slane %v580_v32, %v515_v31  ;;  %v600_v45 = vrot.slane %v592_v30, %v515_v31 }
 0x160   : > { %v957_v57 = vcombine.low %v588_v44, %v600_v45 }
 0x161   : > { %v656_v35 = vpop.permute.xlu1 %655  ;;  %v644_v38 = vpop.permute.xlu0 %643 }
 0x162   : > { %v652_v51 = vrot.slane %v644_v38, %v515_v31  ;;  %v664_v52 = vrot.slane %v656_v35, %v515_v31 }
 0x164   : > { %v959_v3 = vcombine.low %v652_v51, %v664_v52 }
 0x165   : > { %v616_v48 = vpop.permute.xlu1 %615  ;;  %v604_v54 = vpop.permute.xlu0 %603 }
 0x166   : > { %v612_v10 = vrot.slane %v604_v54, %v515_v31  ;;  %v624_v11 = vrot.slane %v616_v48, %v515_v31 }
 0x168   : > { %v958_v23 = vcombine.low %v612_v10, %v624_v11 }
 0x169   : > { %v680_v7 = vpop.permute.xlu1 %679  ;;  %v668_v14 = vpop.permute.xlu0 %667 }
 0x16a   : > { %v676_v17 = vrot.slane %v668_v14, %v515_v31  ;;  %v688_v18 = vrot.slane %v680_v7, %v515_v31 }
 0x16c   : > { %v960_v27 = vcombine.low %v676_v17, %v688_v18 }
 0x16d   : > { %v716_v38 = vpop.permute.xlu0 %715 }
 0x1af   : > { %v482_v36 = vpop.f32.mrb[0].mxu0 }
 0x1b0   : > { %v484_v37 = vpop.f32.mrb[1].mxu0 }
 0x1b1   : > { %v486_v39 = vpop.f32.mrb[2].mxu0 }
 0x1b2   : > { %v501_v41 = vpack.c.bf16 %v486_v39, %v482_v36  ;;  %v488_v42 = vpop.f32.mrb[3].mxu0 }
 0x1b3   : > { %v502_v43 = vpack.c.bf16 %v488_v42, %v484_v37  ;;  %v416_v37 = vld [vmem:[#allocation11] sm:$0x3] }
 0x1b4   : > { %v565_v46 = vadd.bf16 %v955_v40, %v501_v41 }
 0x1b5   : > { %v566_v49 = vadd.bf16 %v955_v40, %v502_v43 }
 0x1b6   : > { %v569_v53 = vmax.bf16 %v1405_v0, %v565_v46 }
 0x1b7   : > { %v570_v55 = vmax.bf16 %v1405_v0, %v566_v49  ;;  %v492_v56 = vpop.f32.mrb[4].mxu0 }
 0x1b8   : > { %v573_v59 = vmin.bf16 %v1407_v58, %v569_v53  ;;  %v494_v60 = vpop.f32.mrb[5].mxu0 }
 0x1b9   : > { %v574_v61 = vmin.bf16 %v1407_v58, %v570_v55  ;;  %v496_v62 = vpop.f32.mrb[6].mxu0 }
 0x1ba   : > { %v503_v4 = vpack.c.bf16 %v496_v62, %v492_v56  ;;  %v498_v5 = vpop.f32.mrb[7].mxu0  ;;  %v637_v6 = vmul.bf16 %v957_v57, %v573_v59 }
 0x1bb   : > { %v504_v8 = vpack.c.bf16 %v498_v5, %v494_v60  ;;  %v638_v9 = vmul.bf16 %v957_v57, %v574_v61 }
 0x1bc   : > { %v567_v12 = vadd.bf16 %v956_v63, %v503_v4  ;;  %v701_v13 = vadd.bf16 %v959_v3, %v637_v6 }
 0x1bd   : > { %v568_v15 = vadd.bf16 %v956_v63, %v504_v8  ;;  %v702_v16 = vadd.bf16 %v959_v3, %v638_v9 }
 0x1be   : > { %v571_v19 = vmax.bf16 %v1405_v0, %v567_v12  ;;  %v705_v20 = vmax.bf16 %v1405_v0, %v701_v13 }
 0x1bf   : > { %v572_v21 = vmax.bf16 %v1405_v0, %v568_v15  ;;  %v706_v22 = vmax.bf16 %v1405_v0, %v702_v16 }
 0x1c0   : > { %v575_v24 = vmin.bf16 %v1407_v58, %v571_v19  ;;  %v709_v29 = vmin.bf16 %v1407_v58, %v705_v20 }
 0x1c1   : > { %v576_v25 = vmin.bf16 %v1407_v58, %v572_v21  ;;  %v710_v26 = vmin.bf16 %v1407_v58, %v706_v22 }
 0x1c2   : > { %v639_v28 = vmul.bf16 %v958_v23, %v575_v24 }
 0x1c3   : > { %v640_v30 = vmul.bf16 %v958_v23, %v576_v25  ;;  %722 = vmatprep.subr.bf16.mxu1 %v710_v26 }
 0x1c4   : > { %723 = vmatpush1.bf16.msra.mxu1 %v709_v29  ;;  %v703_v32 = vadd.bf16 %v960_v27, %v639_v28 }
 0x1c5   : > { %v704_v31 = vadd.bf16 %v960_v27, %v640_v30 }
 0x1c6   : > { %v707_v33 = vmax.bf16 %v1405_v0, %v703_v32 }
 0x1c7   : > { %v708_v34 = vmax.bf16 %v1405_v0, %v704_v31 }
 0x1c8   : > { %v711_v36 = vmin.bf16 %v1407_v58, %v707_v33 }
 0x1c9   : > { %v712_v35 = vmin.bf16 %v1407_v58, %v708_v34 }
 0x1cb   : > { %724 = vmatprep.subr.bf16.mxu1 %v712_v35 }
 0x1cc   : > { %725 = vmatpush1.bf16.msra.mxu1 %v711_v36 }
 0x1cf   : > { %961 = vmatmul.mubr.msk.bf16.vlgmr.msra.gmra.mrb[0].mxu1 %vm718_vm2, %v416_v37 }
 0x2a2   : > { %v756_v39 = vpop.f32.mrb[0].mxu1 }
 0x2a3   : > { %v757_v40 = vadd.f32 %v756_v39, %v716_v38  ;;  %v758_v41 = vpop.f32.mrb[1].mxu1 }
 0x2a4   : > { %v759_v42 = vadd.f32 %v758_v41, %v716_v38  ;;  %v760_v43 = vpop.f32.mrb[2].mxu1 }
 0x2a5   : > { %v763_v44 = vadd.f32 %v757_v40, %v1749_v1  ;;  %v761_v0 = vpop.f32.mrb[3].mxu1 }
 0x2a6   : > { %v764_v45 = vadd.f32 %v759_v42, %v1753_v2 }
 0x2a8   : > { %v767_v46 = vcombine.low %v763_v44, %v764_v45 }
 0x2aa   : > { %769 = vst [vmem:[%s395_s9] sm:$0xff] %v767_v46 }
 0x2ab   : > { %1313 = shalt.err (!%p1310_p8)
}
 0x2ac   : > { %s1314_s1 = scalar_lea.hbm %s1778_s19, 128  ;;  %s1318_s20 = scalar_lea.hbm %s1860_s30, 256 }
 0x2ad   : > { %p1315_p3 = scmp.ne.s32.totalorder %s1778_s19, %s1314_s1  ;;  %p1319_p13 = scmp.lt.u32.totalorder %s1778_s19, %s1860_s30 }
 0x2ae   : > { %p1320_p12 = scmp.lt.u32.totalorder %s1318_s20, %s1314_s1  ;;  %p1322_p2 = scmp.lt.u32.totalorder %s1314_s1, %s1778_s19 }
 0x2af   : > { %p1316_p11 = pnand %p1315_p3, %p1861_p9 }
 0x2b0   : > { %p1321_p4 = por %p1320_p12, %p1319_p13 }
 0x2b1   : > { %p1317_p6 = pneg %p1316_p11 }
 0x2b2   : > { %p1323_p10 = por %p1322_p2, %p1321_p4 }
 0x2b4   : > { %p1324_p1 = pnand %p1323_p10, %p1317_p6 }
 0x2b6   : > { %1327 = shalt.err (!%p1324_p1)
}
 0x2b7   : > { %995 = dma.vmem_to_hbm [thread:$0]  (%p1861_p9), %s1780_s21, 128, %s1778_s19, %s771_s11  }
 0x2b8 PF: > { %s799_s7 = sand.u32 1, %s1374_s24   ;;  %p1862_p0 = scmp.ne.s32.totalorder %s1856_s13, 0 }
 0x2b9   : > { %p1863_p7 = scmp.ge.s32.totalorder %s1394_s29, 2  ;;  %s800_s12 = scalar_lea.sflag [#allocation4], %s799_s7 }
 0x2bb   : > { %p1021_p5 = pnand %p1863_p7, %p1862_p0 }
 0x2bd   : > { %1369 = dma.done.wait (!%p1021_p5), %s800_s12, 128  }
 0x2be   : > { %1371 = vsyncadd (!%p1021_p5), %s800_s12, 4294967168  ;;  %s26_s29 = sadd.s32 1, %s1394_s29   ;;  %s1864_s24 = smov %s1378_s25 }
 0x2bf   : > { %p23_p8 = scmp.ge.s32.totalorder %s26_s29, 4   ;;  %s1865_s25 = smov %s1382_s26 }
 0x2c0   : > { %s1866_s26 = smov %s1673_s10  ;;  %s1867_s27 = smov %s1390_s28 }
 0x2c1   : > { %s1868_s28 = smov %s1870_s18  ;;  %25 = sbr.rel (!%p23_p8) target bundleno = 12 (0xc), region = 117 }
 0x2c8   :  { %805 = vsyncpa [#allocation3], 1 }
 0x2c9   :  { %807 = vsyncpa [#allocation3 + $0x1], 1 }
 0x2ca   :  { %808 = vsyncpa [#allocation6], 1 }
 0x2cb   :  { %809 = vsyncpa [#allocation9], 1 }
 0x2cc   :  { %810 = vsyncpa [#allocation12], 1 }
 0x2cd   :  { %811 = vsyncpa [#allocation4], 1 }
 0x2ce   :  { %813 = vsyncpa [#allocation4 + $0x1], 1 }

</bundles_post_ra>
